<compile_context>
chip_gen: v5e
topology: v5e:2x2
jax: 0.10.0
libtpu: 0.0.40
codegen_flags: <defaults>
</compile_context>

<pallas_src>
import functools

import jax
import jax.numpy as jnp
from jax.experimental import pallas as pl
from jax.experimental.pallas import tpu as pltpu

LANES = 128
SUBLANES = 8
BF16_SUBLANES = 16  # bf16 sublane packing tile


def _round_up(x, m):
    return (x + m - 1) // m * m


# ---------------------------------------------------------------------------
# Fused kernel: (all convs) + bias + ReLU + masked max-over-time + FC
# ---------------------------------------------------------------------------
def _fused_textcnn_kernel(emb_ref, w_ref, b_ref, mask_ref, fcw_ref, fcb_ref,
                          out_ref, *, max_fs, s_tile):
    emb = emb_ref[...]                      # (Bt, S_pad, E)  bfloat16
    bt = emb.shape[0]
    e = emb.shape[2]
    f_pad = w_ref.shape[2]

    # Sliding-window conv as max_fs shifted MXU matmuls.  Batch and time are
    # flattened into one big M dimension (Bt*S_t) so every matmul is
    # (Bt*S_t, E) @ (E, F_pad) instead of Bt tiny batched (S, E) matmuls.
    # Accumulate in float32.
    lhs0 = emb[:, 0:s_tile, :].reshape(bt * s_tile, e)
    acc = jnp.dot(lhs0, w_ref[0], preferred_element_type=jnp.float32)
    for j in range(1, max_fs):              # static unroll over kernel height
        lhs = emb[:, j:j + s_tile, :].reshape(bt * s_tile, e)
        acc = acc + jnp.dot(lhs, w_ref[j], preferred_element_type=jnp.float32)

    # Bias + ReLU (f32 epilogue), then kill invalid time positions with a
    # multiplicative 0/1 mask (valid since ReLU output >= 0) and max-pool.
    acc = jnp.maximum(acc + b_ref[...], 0.0)                 # (Bt*S_t, F_pad)
    acc = acc.reshape(bt, s_tile, f_pad) * mask_ref[...][None, :, :]
    pooled = jnp.max(acc, axis=1)                            # (Bt, F_pad)

    # Fused FC epilogue on the pooled VMEM values (zero-padded weight rows/
    # columns make the padding lanes contribute nothing).
    out_ref[...] = (
        jnp.dot(pooled, fcw_ref[...], preferred_element_type=jnp.float32)
        + fcb_ref[...]
    )


# ---------------------------------------------------------------------------
# Parameters (deterministic synthetic init, matching the module's shapes)
# ---------------------------------------------------------------------------
def init_params(key, vocab_size, embedding_dim, n_filters, filter_sizes,
                output_dim, pad_idx):
    n_keys = 1 + 2 * len(filter_sizes) + 2
    keys = jax.random.split(key, n_keys)
    k = iter(keys)

    embedding = 0.1 * jax.random.normal(
        next(k), (vocab_size, embedding_dim), jnp.float32)
    embedding = embedding.at[pad_idx].set(0.0)   # padding_idx row = 0

    convs = []
    for fs in filter_sizes:
        w = 0.1 * jax.random.normal(
            next(k), (fs, embedding_dim, n_filters), jnp.float32)
        b = 0.1 * jax.random.normal(next(k), (1, n_filters), jnp.float32)
        convs.append((fs, w, b))

    fc_w = 0.1 * jax.random.normal(
        next(k), (len(filter_sizes) * n_filters, output_dim), jnp.float32)
    fc_b = 0.1 * jax.random.normal(next(k), (1, output_dim), jnp.float32)

    return {"embedding": embedding, "convs": convs, "fc_w": fc_w, "fc_b": fc_b}


def pack_params(params, n_filters, filter_sizes, output_dim):
    """Pack per-filter-size conv weights into one lane-dense padded RHS."""
    embedding = params["embedding"]
    embedding_dim = embedding.shape[1]
    max_fs = max(filter_sizes)
    f_total = n_filters * len(filter_sizes)
    f_pad = _round_up(f_total, LANES)
    o_pad = _round_up(output_dim, LANES)

    w_packed = jnp.zeros((max_fs, embedding_dim, f_pad), jnp.float32)
    b_packed = jnp.zeros((1, f_pad), jnp.float32)
    for idx, (fs, w, b) in enumerate(params["convs"]):
        col = idx * n_filters
        w_packed = w_packed.at[:fs, :, col:col + n_filters].set(w)
        b_packed = b_packed.at[:, col:col + n_filters].set(b)

    fc_w = jnp.zeros((f_pad, o_pad), jnp.float32)
    fc_w = fc_w.at[:f_total, :output_dim].set(params["fc_w"])
    fc_b = jnp.zeros((1, o_pad), jnp.float32)
    fc_b = fc_b.at[:, :output_dim].set(params["fc_b"])

    return {
        "embedding": embedding.astype(jnp.bfloat16),   # bf16 table -> bf16 emb
        "w_packed": w_packed.astype(jnp.bfloat16),     # bf16 MXU operands
        "b_packed": b_packed,                          # f32 epilogue
        "fc_w": fc_w,
        "fc_b": fc_b,
        "filter_sizes": tuple(filter_sizes),
        "n_filters": n_filters,
        "output_dim": output_dim,
    }


# ---------------------------------------------------------------------------
# Forward pass
# ---------------------------------------------------------------------------
def cnn_forward(text, packed):
    filter_sizes = packed["filter_sizes"]
    n_filters = packed["n_filters"]
    output_dim = packed["output_dim"]
    max_fs = max(filter_sizes)

    B, S = text.shape
    if S < max_fs:
        raise ValueError(f"sequence length {S} shorter than largest filter {max_fs}")

    emb_table = packed["embedding"]                # (V, E) bf16
    E = emb_table.shape[1]

    # Embedding lookup (gather) stays in plain JAX; it feeds the kernel bf16
    # activations so the dominant HBM read of `emb` is half-width.
    emb = jnp.take(emb_table, text, axis=0)        # (B, S, E) bf16

    # Batch-tile grid (parallel -> megacore / v7x 2-TC split).
    bt = min(128, _round_up(B, SUBLANES))
    b_pad = _round_up(B, bt)
    # Conv time positions computed in-kernel (rounded to the bf16 sublane tile
    # so the in-kernel flatten reshape is layout-clean); extras are masked.
    s_tile = _round_up(S, BF16_SUBLANES)
    s_pad = _round_up(s_tile + max_fs - 1, BF16_SUBLANES)
    emb = jnp.pad(emb, ((0, b_pad - B), (0, s_pad - S), (0, 0)))

    f_pad = packed["w_packed"].shape[2]
    o_pad = packed["fc_w"].shape[1]

    # Validity mask (0/1): filter size fs has only S - fs + 1 valid output
    # positions; tail / time-padding positions are zeroed before the max
    # (safe because ReLU output >= 0).  Padding columns stay fully masked.
    t_idx = jnp.arange(s_tile, dtype=jnp.int32)[:, None]         # (S_t, 1)
    valid_len = jnp.zeros((f_pad,), jnp.int32)
    for idx, fs in enumerate(filter_sizes):
        col = idx * n_filters
        valid_len = valid_len.at[col:col + n_filters].set(S - fs + 1)
    mask = (t_idx < valid_len[None, :]).astype(jnp.float32)       # (S_t, F_pad)

    kernel = functools.partial(_fused_textcnn_kernel, max_fs=max_fs,
                               s_tile=s_tile)

    out = pl.pallas_call(
        kernel,
        out_shape=jax.ShapeDtypeStruct((b_pad, o_pad), jnp.float32),
        grid=(b_pad // bt,),
        in_specs=[
            pl.BlockSpec((bt, s_pad, E), lambda i: (i, 0, 0)),
            pl.BlockSpec((max_fs, E, f_pad), lambda i: (0, 0, 0)),
            pl.BlockSpec((1, f_pad), lambda i: (0, 0)),
            pl.BlockSpec((s_tile, f_pad), lambda i: (0, 0)),
            pl.BlockSpec((f_pad, o_pad), lambda i: (0, 0)),
            pl.BlockSpec((1, o_pad), lambda i: (0, 0)),
        ],
        out_specs=pl.BlockSpec((bt, o_pad), lambda i: (i, 0)),
        compiler_params=pltpu.CompilerParams(
            dimension_semantics=("parallel",),
        ),
    )(emb, packed["w_packed"], packed["b_packed"], mask,
      packed["fc_w"], packed["fc_b"])

    # Dropout is identity at inference time (eval mode).
    # TODO(synk): training-mode dropout (random mask) not implemented.
    return out[:B, :output_dim]


# ---------------------------------------------------------------------------
if __name__ == "__main__":
    vocab_size = 50
    embedding_dim = 32
    n_filters = 8
    filter_sizes = (2, 3, 4)
    output_dim = 4
    pad_idx = 0
    batch, seq = 2, 16

    root = jax.random.PRNGKey(0)
    k_params, k_text = jax.random.split(root)

    raw_params = init_params(k_params, vocab_size, embedding_dim, n_filters,
                             filter_sizes, output_dim, pad_idx)
    packed = pack_params(raw_params, n_filters, filter_sizes, output_dim)

    text = jax.random.randint(
        k_text, (batch, seq), minval=0, maxval=vocab_size, dtype=jnp.int32)

    out = cnn_forward(text, packed)
    out = jax.block_until_ready(out)
    assert out.shape == (batch, output_dim), out.shape
    assert out.dtype == jnp.float32
    assert bool(jnp.all(jnp.isfinite(out)))
    print("KERNEL_OK")
</pallas_src>

<mosaic_0001>
module attributes {stable_mosaic.version = 11 : i64} {
  func.func @_fused_textcnn_kernel(%arg0: i32, %arg1: memref<8x32x32xbf16, #tpu.memory_space<vmem>>, %arg2: memref<4x32x128xbf16, #tpu.memory_space<vmem>>, %arg3: memref<1x128xf32, #tpu.memory_space<vmem>>, %arg4: memref<16x128xf32, #tpu.memory_space<vmem>>, %arg5: memref<128x128xf32, #tpu.memory_space<vmem>>, %arg6: memref<1x128xf32, #tpu.memory_space<vmem>>, %arg7: memref<8x128xf32, #tpu.memory_space<vmem>>) attributes {dimension_semantics = [#tpu.dimension_semantics<parallel>], iteration_bounds = array<i64: 1>, scalar_prefetch = 0 : i64, scratch_operands = 0 : i64, tpu.core_type = #tpu.core_type<tc>, window_params = [{transform_indices = @transform_0, window_bounds = array<i64: 8, 32, 32>}, {pipeline_mode = #tpu.pipeline_mode<synchronous>, transform_indices = @transform_1, window_bounds = array<i64: 4, 32, 128>}, {pipeline_mode = #tpu.pipeline_mode<synchronous>, transform_indices = @transform_2, window_bounds = array<i64: 1, 128>}, {pipeline_mode = #tpu.pipeline_mode<synchronous>, transform_indices = @transform_3, window_bounds = array<i64: 16, 128>}, {pipeline_mode = #tpu.pipeline_mode<synchronous>, transform_indices = @transform_4, window_bounds = array<i64: 128, 128>}, {pipeline_mode = #tpu.pipeline_mode<synchronous>, transform_indices = @transform_5, window_bounds = array<i64: 1, 128>}, {transform_indices = @transform_6, window_bounds = array<i64: 8, 128>}]} {
    %c0 = arith.constant 0 : index
    %c0_0 = arith.constant 0 : index
    %c0_1 = arith.constant 0 : index
    %0 = vector.load %arg1[%c0, %c0_0, %c0_1] : memref<8x32x32xbf16, #tpu.memory_space<vmem>>, vector<8x32x32xbf16>
    %1 = vector.extract_strided_slice %0 {offsets = [0, 0, 0], sizes = [8, 16, 32], strides = [1, 1, 1]} : vector<8x32x32xbf16> to vector<8x16x32xbf16>
    %2 = vector.shape_cast %1 : vector<8x16x32xbf16> to vector<128x32xbf16>
    %c0_2 = arith.constant 0 : index
    %c0_3 = arith.constant 0 : index
    %c0_4 = arith.constant 0 : index
    %3 = vector.load %arg2[%c0_2, %c0_3, %c0_4] : memref<4x32x128xbf16, #tpu.memory_space<vmem>>, vector<1x32x128xbf16>
    %4 = vector.shape_cast %3 : vector<1x32x128xbf16> to vector<32x128xbf16>
    %cst = arith.constant dense<0.000000e+00> : vector<128x128xf32>
    %5 = tpu.matmul %2, %4, %cst {dimension_numbers = #tpu.dot_dimension_numbers<[1], [0], [0], [1], [0, 0, 1, 1], [], []>} : vector<128x32xbf16>, vector<32x128xbf16>, vector<128x128xf32> -> vector<128x128xf32>
    %6 = vector.extract_strided_slice %0 {offsets = [0, 1, 0], sizes = [8, 16, 32], strides = [1, 1, 1]} : vector<8x32x32xbf16> to vector<8x16x32xbf16>
    %7 = vector.shape_cast %6 : vector<8x16x32xbf16> to vector<128x32xbf16>
    %c1 = arith.constant 1 : index
    %c0_5 = arith.constant 0 : index
    %c0_6 = arith.constant 0 : index
    %8 = vector.load %arg2[%c1, %c0_5, %c0_6] : memref<4x32x128xbf16, #tpu.memory_space<vmem>>, vector<1x32x128xbf16>
    %9 = vector.shape_cast %8 : vector<1x32x128xbf16> to vector<32x128xbf16>
    %cst_7 = arith.constant dense<0.000000e+00> : vector<128x128xf32>
    %10 = tpu.matmul %7, %9, %cst_7 {dimension_numbers = #tpu.dot_dimension_numbers<[1], [0], [0], [1], [0, 0, 1, 1], [], []>} : vector<128x32xbf16>, vector<32x128xbf16>, vector<128x128xf32> -> vector<128x128xf32>
    %11 = arith.addf %5, %10 : vector<128x128xf32>
    %12 = vector.extract_strided_slice %0 {offsets = [0, 2, 0], sizes = [8, 16, 32], strides = [1, 1, 1]} : vector<8x32x32xbf16> to vector<8x16x32xbf16>
    %13 = vector.shape_cast %12 : vector<8x16x32xbf16> to vector<128x32xbf16>
    %c2 = arith.constant 2 : index
    %c0_8 = arith.constant 0 : index
    %c0_9 = arith.constant 0 : index
    %14 = vector.load %arg2[%c2, %c0_8, %c0_9] : memref<4x32x128xbf16, #tpu.memory_space<vmem>>, vector<1x32x128xbf16>
    %15 = vector.shape_cast %14 : vector<1x32x128xbf16> to vector<32x128xbf16>
    %cst_10 = arith.constant dense<0.000000e+00> : vector<128x128xf32>
    %16 = tpu.matmul %13, %15, %cst_10 {dimension_numbers = #tpu.dot_dimension_numbers<[1], [0], [0], [1], [0, 0, 1, 1], [], []>} : vector<128x32xbf16>, vector<32x128xbf16>, vector<128x128xf32> -> vector<128x128xf32>
    %17 = arith.addf %11, %16 : vector<128x128xf32>
    %18 = vector.extract_strided_slice %0 {offsets = [0, 3, 0], sizes = [8, 16, 32], strides = [1, 1, 1]} : vector<8x32x32xbf16> to vector<8x16x32xbf16>
    %19 = vector.shape_cast %18 : vector<8x16x32xbf16> to vector<128x32xbf16>
    %c3 = arith.constant 3 : index
    %c0_11 = arith.constant 0 : index
    %c0_12 = arith.constant 0 : index
    %20 = vector.load %arg2[%c3, %c0_11, %c0_12] : memref<4x32x128xbf16, #tpu.memory_space<vmem>>, vector<1x32x128xbf16>
    %21 = vector.shape_cast %20 : vector<1x32x128xbf16> to vector<32x128xbf16>
    %cst_13 = arith.constant dense<0.000000e+00> : vector<128x128xf32>
    %22 = tpu.matmul %19, %21, %cst_13 {dimension_numbers = #tpu.dot_dimension_numbers<[1], [0], [0], [1], [0, 0, 1, 1], [], []>} : vector<128x32xbf16>, vector<32x128xbf16>, vector<128x128xf32> -> vector<128x128xf32>
    %23 = arith.addf %17, %22 : vector<128x128xf32>
    %c0_14 = arith.constant 0 : index
    %c0_15 = arith.constant 0 : index
    %24 = vector.load %arg3[%c0_14, %c0_15] : memref<1x128xf32, #tpu.memory_space<vmem>>, vector<1x128xf32>
    %25 = vector.broadcast %24 : vector<1x128xf32> to vector<128x128xf32>
    %26 = arith.addf %23, %25 : vector<128x128xf32>
    %cst_16 = arith.constant 0.000000e+00 : f32
    %27 = vector.broadcast %cst_16 : f32 to vector<128x128xf32>
    %28 = arith.maximumf %26, %27 : vector<128x128xf32>
    %29 = vector.shape_cast %28 : vector<128x128xf32> to vector<8x16x128xf32>
    %c0_17 = arith.constant 0 : index
    %c0_18 = arith.constant 0 : index
    %30 = vector.load %arg4[%c0_17, %c0_18] : memref<16x128xf32, #tpu.memory_space<vmem>>, vector<16x128xf32>
    %31 = vector.shape_cast %30 : vector<16x128xf32> to vector<1x16x128xf32>
    %32 = vector.broadcast %31 : vector<1x16x128xf32> to vector<8x16x128xf32>
    %33 = arith.mulf %29, %32 : vector<8x16x128xf32>
    %cst_19 = arith.constant dense<0xFF800000> : vector<8x128xf32>
    %34 = vector.multi_reduction <maximumf>, %33, %cst_19 [1] : vector<8x16x128xf32> to vector<8x128xf32>
    %c0_20 = arith.constant 0 : index
    %c0_21 = arith.constant 0 : index
    %35 = vector.load %arg5[%c0_20, %c0_21] : memref<128x128xf32, #tpu.memory_space<vmem>>, vector<128x128xf32>
    %cst_22 = arith.constant dense<0.000000e+00> : vector<8x128xf32>
    %36 = tpu.matmul %34, %35, %cst_22 {dimension_numbers = #tpu.dot_dimension_numbers<[1], [0], [0], [1], [0, 0, 1, 1], [], []>} : vector<8x128xf32>, vector<128x128xf32>, vector<8x128xf32> -> vector<8x128xf32>
    %c0_23 = arith.constant 0 : index
    %c0_24 = arith.constant 0 : index
    %37 = vector.load %arg6[%c0_23, %c0_24] : memref<1x128xf32, #tpu.memory_space<vmem>>, vector<1x128xf32>
    %38 = vector.broadcast %37 : vector<1x128xf32> to vector<8x128xf32>
    %39 = arith.addf %36, %38 : vector<8x128xf32>
    %c0_25 = arith.constant 0 : index
    %c0_26 = arith.constant 0 : index
    %40 = vector.load %arg7[%c0_25, %c0_26] : memref<8x128xf32, #tpu.memory_space<vmem>>, vector<8x128xf32>
    tpu.vector_store %arg7[%c0_25, %c0_26], %39 {strides = array<i32>} : memref<8x128xf32, #tpu.memory_space<vmem>>, vector<8x128xf32>,
    return
  }
  func.func @transform_0(%arg0: i32) -> (i32, i32, i32) {
    %c0_i32 = arith.constant 0 : i32
    %c0_i32_0 = arith.constant 0 : i32
    %c0_i32_1 = arith.constant 0 : i32
    return %arg0, %c0_i32, %c0_i32_0 : i32, i32, i32
  }
  func.func @transform_1(%arg0: i32) -> (i32, i32, i32) {
    %c0_i32 = arith.constant 0 : i32
    %c0_i32_0 = arith.constant 0 : i32
    %c0_i32_1 = arith.constant 0 : i32
    %c0_i32_2 = arith.constant 0 : i32
    return %c0_i32, %c0_i32_0, %c0_i32_1 : i32, i32, i32
  }
  func.func @transform_2(%arg0: i32) -> (i32, i32) {
    %c0_i32 = arith.constant 0 : i32
    %c0_i32_0 = arith.constant 0 : i32
    %c0_i32_1 = arith.constant 0 : i32
    return %c0_i32, %c0_i32_0 : i32, i32
  }
  func.func @transform_3(%arg0: i32) -> (i32, i32) {
    %c0_i32 = arith.constant 0 : i32
    %c0_i32_0 = arith.constant 0 : i32
    %c0_i32_1 = arith.constant 0 : i32
    return %c0_i32, %c0_i32_0 : i32, i32
  }
  func.func @transform_4(%arg0: i32) -> (i32, i32) {
    %c0_i32 = arith.constant 0 : i32
    %c0_i32_0 = arith.constant 0 : i32
    %c0_i32_1 = arith.constant 0 : i32
    return %c0_i32, %c0_i32_0 : i32, i32
  }
  func.func @transform_5(%arg0: i32) -> (i32, i32) {
    %c0_i32 = arith.constant 0 : i32
    %c0_i32_0 = arith.constant 0 : i32
    %c0_i32_1 = arith.constant 0 : i32
    return %c0_i32, %c0_i32_0 : i32, i32
  }
  func.func @transform_6(%arg0: i32) -> (i32, i32) {
    %c0_i32 = arith.constant 0 : i32
    %c0_i32_0 = arith.constant 0 : i32
    return %arg0, %c0_i32 : i32, i32
  }
}

</mosaic_0001>

<bundles_post_ra>
// kernel: tpu_custom_call.1
= control target key start
LH: loop header
LB: loop body
LE: loop exit
PB: predicated region body
PF: predicated region fallthrough
CT: control target
= control target key end

     0   :  { %11 = vsyncpa [#allocation3], 0  ;;  %s1706_s0 = inlined_call_operand.hbm [shape: bf16[8,32,32], index: 0, kind: input, shape index: {}]   ;;  %s1707_s1 = inlined_call_operand.hbm [shape: bf16[4,32,128], index: 1, kind: input, shape index: {}]   ;;  %s1708_s2 = inlined_call_operand.vmem [shape: f32[1,128], index: 2, kind: input, shape index: {}]   ;;  %s1709_s3 = inlined_call_operand.hbm [shape: f32[16,128], index: 3, kind: input, shape index: {}]   ;;  %s1710_s4 = inlined_call_operand.hbm [shape: f32[128,128], index: 4, kind: input, shape index: {}]   ;;  %s1711_s5 = inlined_call_operand.vmem [shape: f32[1,128], index: 5, kind: input, shape index: {}]   ;;  %s1712_s6 = inlined_call_operand.hbm [shape: f32[8,128], index: 6, kind: output, shape index: {}]  }
   0x1   :  { %12 = vsyncpa [#allocation6], 0 }
   0x2   :  { %13 = vsyncpa [#allocation9], 0 }
   0x3   :  { %14 = vsyncpa [#allocation4], 0  ;;  %s32_s23 = sshll.u32 %s1707_s1, 4  ;;  %s1453_s24 = smov [#allocation5]   ;;  %s33_s23 = int_to_ptr.hbm [resolvable:$true] %s32_s23 }
   0x4   :  { %s34_s25 = sshll.u32 %s1453_s24, 4  ;;  %s19_s28 = sshll.u32 %s1706_s0, 4  ;;  %s35_s25 = int_to_ptr.vmem [resolvable:$true] %s34_s25  ;;  %s20_s28 = int_to_ptr.hbm [resolvable:$true] %s19_s28 }
   0x5   :  { %s1454_s29 = smov 64   ;;  %s1455_s30 = smov 4  }
   0x6   :  { %40 = dma.hbm_to_vmem [thread:$0]  %s33_s23, 1024, %s35_s25, [#allocation6], %s1454_s29, %s1454_s29, %s1455_s30  }
   0x7   :  { %s1456_s7 = smov [#allocation2]   ;;  %s47_s11 = sshll.u32 %s1709_s3, 4  ;;  %s48_s11 = int_to_ptr.hbm [resolvable:$true] %s47_s11 }
   0x8   :  { %s21_s8 = sshll.u32 %s1456_s7, 4  ;;  %s1457_s1 = smov [#allocation7]   ;;  %s22_s8 = int_to_ptr.vmem [resolvable:$true] %s21_s8 }
   0x9   :  { %27 = dma.hbm_to_vmem [thread:$0]  %s20_s28, 2048, %s22_s8, [#allocation3], %s1454_s29, %s1454_s29, %s1455_s30  }
   0xa   :  { %s49_s12 = sshll.u32 %s1457_s1, 4  ;;  %s60_s0 = sshll.u32 %s1710_s4, 4  ;;  %s50_s12 = int_to_ptr.vmem [resolvable:$true] %s49_s12  ;;  %s61_s0 = int_to_ptr.hbm [resolvable:$true] %s60_s0 }
   0xb   :  { %s1458_s15 = smov 128   ;;  %s1459_s16 = smov 8  }
   0xc   :  { %55 = dma.hbm_to_vmem [thread:$0]  %s48_s11, 256, %s50_s12, [#allocation6], %s1458_s15, %s1458_s15, %s1459_s16  }
   0xd   :  { %s1460_s17 = smov [#allocation8]  }
   0xe   :  { %s62_s18 = sshll.u32 %s1460_s17, 4  ;;  %s63_s18 = int_to_ptr.vmem [resolvable:$true] %s62_s18 }
   0xf   :  { %68 = dma.hbm_to_vmem [thread:$0]  %s61_s0, 2048, %s63_s18, [#allocation9], %s1458_s15, %s1458_s15, %s1459_s16  }
  0x10   :  { %1445 = dma.done.wait [#allocation3], 2048  }
  0x11   :  { %1446 = vsyncadd [#allocation3], 4294965248 }
  0x12   :  { %1447 = dma.done.wait [#allocation6], 1280  }
  0x13   :  { %1448 = vsyncadd [#allocation6], 4294966016 }
  0x14   :  { %1449 = dma.done.wait [#allocation9], 2048  }
  0x15   :  { %1450 = vsyncadd [#allocation9], 4294965248  ;;  %vm559_vm0 = vcmask 1042432   ;;  %vm560_vm1 = vcmask 1046532   ;;  %vm116_vm2 = vsmask.f32 3328 }
  0x16   :  { %v1307_v0 = vld [vmem:[#allocation5 + $0x8] sm:$0xff]  ;;  %v1309_v2 = vld [vmem:[#allocation5 + $0x18] sm:$0xff]  ;;  %vm117_vm3 = vsmask.f32 7440  ;;  %v1306_v3 = vld [vmem:[#allocation5] sm:$0xff]  ;;  %vm352_vm7 = vcmask 261120  }
  0x17   :  { %v1311_v1 = vld [vmem:[#allocation5 + $0x28] sm:$0xff]  ;;  %v1313_v4 = vld [vmem:[#allocation5 + $0x38] sm:$0xff]  ;;  %vm1509_vm4 = vmor %vm559_vm0, %vm560_vm1  ;;  %vm748_vm5 = vsmask.f32 2304  ;;  %vm749_vm6 = vsmask.f32 6416  ;;  %508 = vmatpush.bf16.msra.mxu1 %v1307_v0  ;;  %383 = vmatpush.bf16.msra.mxu0 %v1309_v2 }
  0x18   :  { %689 = vmatpush.bf16.msra.mxu2 %v1311_v1  ;;  %v1310_v6 = vld [vmem:[#allocation5 + $0x20] sm:$0xff]  ;;  %942 = vmatpush.bf16.msra.mxu3 %v1313_v4  ;;  %v90_v9 = vld [vmem:[#allocation2 + $0x8] sm:$0xf]  ;;  %v1308_v12 = vld [vmem:[#allocation5 + $0x10] sm:$0xff]  ;;  %vm1139_vm10 = vcmask 1041409   ;;  %vm1141_vm11 = vcmask 1042434  }
  0x19   :  { %v88_v7 = vld [vmem:[#allocation2] sm:$0xf]  ;;  %v89_v8 = vld [vmem:[#allocation2 + $0x4] sm:$0xf]  ;;  %v1312_v13 = vld [vmem:[#allocation5 + $0x30] sm:$0xff]  ;;  %v567_v14 = vrot.slane %v90_v9, 5 }
  0x1a   :  { %v1258_v10 = vrot.slane %v88_v7, 9  ;;  %v564_v11 = vrot.slane %v89_v8, 5  ;;  %v120_v15 = vshrl.u32 %v88_v7, 16  ;;  %v123_v16 = vshll.u32 %v88_v7, 16  ;;  %v1298_v18 = vld [vmem:[#allocation2] sm:$0xff]  ;;  %vm1520_vm8 = vmor %vm116_vm2, %vm117_vm3  ;;  %v1126_v48 = vld [vmem:[#allocation8 + $0x78] sm:$0xff] }
  0x1b   :  { %v129_v17 = vshll.u32 %v89_v8, 16  ;;  %v133_v21 = vshrl.u32 %v89_v8, 16  ;;  %v139_v22 = vshll.u32 %v90_v9, 16  ;;  %509 = vmatpush.bf16.msra.mxu1 %v1306_v3  ;;  %384 = vmatpush.bf16.msra.mxu0 %v1308_v12  ;;  %v91_v35 = vld [vmem:[#allocation2 + $0x10] sm:$0xf]  ;;  %v760_v40 = vshrl.u32 %v90_v9, 16  ;;  %vm1526_vm9 = vmor %vm748_vm5, %vm749_vm6 }
  0x1c   :  { %v565_v19 = vsel %vm1509_vm4, %v1258_v10, %v564_v11  ;;  %v566_v20 = vrot.slane %v564_v11, 4  ;;  %690 = vmatpush.bf16.msra.mxu2 %v1310_v6  ;;  %v122_v24 = vrot.slane %v120_v15, 4  ;;  %v125_v25 = vrot.slane %v123_v16, 5  ;;  %943 = vmatpush.bf16.msra.mxu3 %v1312_v13  ;;  %v92_v36 = vld [vmem:[#allocation2 + $0x14] sm:$0xf]  ;;  %s1461_s20 = smov [#allocation10]  }
  0x1d   :  { %v623_v23 = vunpack.c.l.b16 %v565_v19  ;;  %v131_v26 = vrot.slane %v129_v17, 5  ;;  %v135_v28 = vrot.slane %v133_v21, 4  ;;  %v141_v29 = vrot.slane %v139_v22, 5  ;;  %v93_v42 = vld [vmem:[#allocation2 + $0x18] sm:$0xf]  ;;  %s1180_s21 = sshll.u32 %s1461_s20, 4  ;;  %s1181_s21 = int_to_ptr.vmem [resolvable:$true] %s1180_s21 }
  0x1e   :  { %v568_v27 = vsel %vm1509_vm4, %v566_v20, %v567_v14  ;;  %v751_v30 = vrot.slane %v120_v15, 5  ;;  %v126_v32 = vor.u32 %v125_v25, %v122_v24  ;;  %v752_v33 = vrot.slane %v123_v16, 6  ;;  %1250 = vmatmul.msk.bf16.vlgmr.msra.gmra.mxu1 %vm352_vm7, %v1298_v18  ;;  %v1299_v24 = vld [vmem:[#allocation2 + $0x10] sm:$0xff]  ;;  %s1182_s24 = sshll.u32 %s1712_s6, 4  ;;  %s1183_s24 = int_to_ptr.hbm [resolvable:$true] %s1182_s24 }
  0x1f   :  { %v624_v31 = vunpack.c.l.b16 %v568_v27  ;;  %v755_v34 = vrot.slane %v133_v21, 5  ;;  %v136_v38 = vor.u32 %v135_v28, %v131_v26  ;;  %v756_v39 = vrot.slane %v129_v17, 6  ;;  %1154 = vmatpush.msrb.mxu0 %v1126_v48 }
  0x20   :  { %v763_v41 = vrot.slane %v139_v22, 6  ;;  %v127_v44 = vrot.slane %v126_v32, 4  ;;  %v753_v45 = vor.u32 %v752_v33, %v751_v30  ;;  %v1259_v46 = vrot.slane %v91_v35, 9 }
  0x21   :  { %v639_v43 = vpack.c.b16 %v624_v31, %v623_v23  ;;  %v137_v47 = vrot.slane %v136_v38, 4  ;;  %v757_v49 = vor.u32 %v756_v39, %v755_v34  ;;  %v762_v50 = vrot.slane %v760_v40, 5  ;;  %v94_v23 = vld [vmem:[#allocation2 + $0x20] sm:$0xf] }
  0x22   :  { %v571_v51 = vrot.slane %v92_v36, 5  ;;  %v132_v52 = vsel %vm1520_vm8, %v127_v44, %v131_v26  ;;  %v754_v53 = vrot.slane %v753_v45, 4  ;;  %v574_v54 = vrot.slane %v93_v42, 5  ;;  %v96_v44 = vld [vmem:[#allocation2 + $0x28] sm:$0xf] }
  0x23   :  { %1274 = vmatmul.msk.bf16.vlgmr.msra.gmra.mxu2 %vm352_vm7, %v639_v43  ;;  %v144_v55 = vshrl.u32 %v91_v35, 16  ;;  %v142_v56 = vsel %vm1520_vm8, %v137_v47, %v141_v29  ;;  %v316_v57 = vunpack.c.l.b16 %v132_v52  ;;  %v759_v58 = vrot.slane %v757_v49, 4  ;;  %v95_v29 = vld [vmem:[#allocation2 + $0x24] sm:$0xf] }
  0x24   :  { %v764_v59 = vor.u32 %v763_v41, %v762_v50  ;;  %v317_v60 = vunpack.c.l.b16 %v142_v56  ;;  %v758_v61 = vsel %vm1526_vm9, %v754_v53, %v757_v49  ;;  %v573_v62 = vrot.slane %v571_v51, 4 }
  0x25   :  { %v876_v0 = vunpack.c.l.b16 %v758_v61  ;;  %v572_v1 = vsel %vm1509_vm4, %v1259_v46, %v571_v51  ;;  %v146_v2 = vrot.slane %v144_v55, 4  ;;  %v147_v7 = vshll.u32 %v91_v35, 16 }
  0x26   :  { %v765_v63 = vsel %vm1526_vm9, %v759_v58, %v764_v59  ;;  %v332_v3 = vpack.c.b16 %v317_v60, %v316_v57  ;;  %v575_v6 = vsel %vm1509_vm4, %v573_v62, %v574_v54  ;;  %v153_v8 = vshll.u32 %v92_v36, 16 }
  0x27   :  { %v877_v4 = vunpack.c.l.b16 %v765_v63  ;;  %v157_v9 = vshrl.u32 %v92_v36, 16  ;;  %v163_v10 = vshll.u32 %v93_v42, 16  ;;  %v149_v12 = vrot.slane %v147_v7, 5 }
  0x28   :  { %1202 = vmatmul.msk.bf16.vlgmr.msra.gmra.mxu0 %vm352_vm7, %v332_v3  ;;  %v766_v13 = vrot.slane %v144_v55, 5  ;;  %v767_v14 = vrot.slane %v147_v7, 6  ;;  %v625_v15 = vunpack.c.l.b16 %v572_v1  ;;  %v626_v16 = vunpack.c.l.b16 %v575_v6 }
  0x29   :  { %v892_v11 = vpack.c.b16 %v877_v4, %v876_v0  ;;  %v155_v17 = vrot.slane %v153_v8, 5  ;;  %v159_v18 = vrot.slane %v157_v9, 4  ;;  %v150_v19 = vor.u32 %v149_v12, %v146_v2 }
  0x2a   :  { %v768_v20 = vor.u32 %v767_v14, %v766_v13  ;;  %v770_v21 = vrot.slane %v157_v9, 5  ;;  %v771_v22 = vrot.slane %v153_v8, 6  ;;  %v165_v26 = vrot.slane %v163_v10, 5  ;;  %v97_v14 = vld [vmem:[#allocation2 + $0x30] sm:$0xf] }
  0x2b   :  { %1290 = vmatmul.msk.bf16.vlgmr.msra.gmra.mxu3 %vm352_vm7, %v892_v11  ;;  %v160_v25 = vor.u32 %v159_v18, %v155_v17  ;;  %v775_v27 = vshrl.u32 %v93_v42, 16  ;;  %v778_v28 = vrot.slane %v163_v10, 6  ;;  %v151_v30 = vrot.slane %v150_v19, 4  ;;  %v98_v18 = vld [vmem:[#allocation2 + $0x34] sm:$0xf] }
  0x2c   :  { %v769_v31 = vrot.slane %v768_v20, 4  ;;  %v772_v32 = vor.u32 %v771_v22, %v770_v21  ;;  %v168_v35 = vshrl.u32 %v94_v23, 16  ;;  %v640_v36 = vpack.c.b16 %v626_v16, %v625_v15  ;;  %v1300_v22 = vld [vmem:[#allocation2 + $0x20] sm:$0xff] }
  0x2d   :  { %v161_v33 = vrot.slane %v160_v25, 4  ;;  %v777_v34 = vrot.slane %v775_v27, 5  ;;  %v156_v38 = vsel %vm1520_vm8, %v151_v30, %v155_v17  ;;  %v578_v40 = vrot.slane %v95_v29, 5 }
  0x2e   :  { %v774_v39 = vrot.slane %v772_v32, 4  ;;  %1251 = vmatmul.msk.bf16.gmra.mxu1 %vm352_vm7, %v1299_v24  ;;  %v773_v42 = vsel %vm1526_vm9, %v769_v31, %v772_v32  ;;  %v318_v45 = vunpack.c.l.b16 %v156_v38  ;;  %v1260_v47 = vrot.slane %v94_v23, 9 }
  0x2f   :  { %v166_v41 = vsel %vm1520_vm8, %v161_v33, %v165_v26  ;;  %v779_v43 = vor.u32 %v778_v28, %v777_v34  ;;  %v170_v49 = vrot.slane %v168_v35, 4  ;;  %v171_v51 = vshll.u32 %v94_v23, 16  ;;  %v99_v34 = vld [vmem:[#allocation2 + $0x38] sm:$0xf] }
  0x30   :  { %v319_v46 = vunpack.c.l.b16 %v166_v41  ;;  %v177_v52 = vshll.u32 %v95_v29, 16  ;;  %v181_v53 = vshrl.u32 %v95_v29, 16  ;;  %v878_v54 = vunpack.c.l.b16 %v773_v42 }
  0x31   :  { %v780_v50 = vsel %vm1526_vm9, %v774_v39, %v779_v43  ;;  %v580_v56 = vrot.slane %v578_v40, 4  ;;  %v581_v57 = vrot.slane %v96_v44, 5  ;;  %v173_v58 = vrot.slane %v171_v51, 5 }
  0x32   :  { %v879_v55 = vunpack.c.l.b16 %v780_v50  ;;  %v179_v59 = vrot.slane %v177_v52, 5  ;;  %v183_v60 = vrot.slane %v181_v53, 4  ;;  %v187_v61 = vshll.u32 %v96_v44, 16 }
  0x33   :  { %1275 = vmatmul.msk.bf16.gmra.mxu2 %vm352_vm7, %v640_v36  ;;  %v333_v62 = vpack.c.b16 %v319_v46, %v318_v45  ;;  %v781_v63 = vrot.slane %v168_v35, 5  ;;  %v782_v0 = vrot.slane %v171_v51, 6  ;;  %v174_v1 = vor.u32 %v173_v58, %v170_v49 }
  0x34   :  { %v184_v2 = vor.u32 %v183_v60, %v179_v59  ;;  %v785_v3 = vrot.slane %v181_v53, 5  ;;  %v893_v4 = vpack.c.b16 %v879_v55, %v878_v54  ;;  %v786_v7 = vrot.slane %v177_v52, 6 }
  0x35   :  { %v783_v6 = vor.u32 %v782_v0, %v781_v63  ;;  %v790_v8 = vshrl.u32 %v96_v44, 16  ;;  %v579_v9 = vsel %vm1509_vm4, %v1260_v47, %v578_v40  ;;  %v582_v10 = vsel %vm1509_vm4, %v580_v56, %v581_v57 }
  0x36   :  { %v793_v11 = vrot.slane %v187_v61, 6  ;;  %v787_v12 = vor.u32 %v786_v7, %v785_v3  ;;  %v175_v15 = vrot.slane %v174_v1, 4  ;;  %v185_v16 = vrot.slane %v184_v2, 4 }
  0x37   :  { %v792_v13 = vrot.slane %v790_v8, 5  ;;  %v189_v17 = vrot.slane %v187_v61, 5  ;;  %v627_v19 = vunpack.c.l.b16 %v579_v9  ;;  %v628_v20 = vunpack.c.l.b16 %v582_v10 }
  0x38   :  { %1203 = vmatmul.msk.bf16.gmra.mxu0 %vm352_vm7, %v333_v62  ;;  %v784_v21 = vrot.slane %v783_v6, 4  ;;  %v789_v23 = vrot.slane %v787_v12, 4  ;;  %v585_v25 = vrot.slane %v98_v18, 5  ;;  %v192_v26 = vshrl.u32 %v97_v14, 16  ;;  %v101_v6 = vld [vmem:[#allocation2 + $0x44] sm:$0xf] }
  0x39   :  { %v794_v24 = vor.u32 %v793_v11, %v792_v13  ;;  %v195_v27 = vshll.u32 %v97_v14, 16  ;;  %v180_v28 = vsel %vm1520_vm8, %v175_v15, %v179_v59  ;;  %v190_v29 = vsel %vm1520_vm8, %v185_v16, %v189_v17  ;;  %v1301_v11 = vld [vmem:[#allocation2 + $0x30] sm:$0xff]  ;;  %v102_v16 = vld [vmem:[#allocation2 + $0x48] sm:$0xf] }
  0x3a   :  { %v201_v30 = vshll.u32 %v98_v18, 16  ;;  %v205_v31 = vshrl.u32 %v98_v18, 16  ;;  %v641_v32 = vpack.c.b16 %v628_v20, %v627_v19  ;;  %v788_v33 = vsel %vm1526_vm9, %v784_v21, %v787_v12 }
  0x3b   :  { %1291 = vmatmul.msk.bf16.gmra.mxu3 %vm352_vm7, %v893_v4  ;;  %v194_v35 = vrot.slane %v192_v26, 4  ;;  %v197_v36 = vrot.slane %v195_v27, 5  ;;  %v795_v38 = vsel %vm1526_vm9, %v789_v23, %v794_v24  ;;  %v320_v41 = vunpack.c.l.b16 %v180_v28  ;;  %v100_v4 = vld [vmem:[#allocation2 + $0x40] sm:$0xf] }
  0x3c   :  { %v203_v39 = vrot.slane %v201_v30, 5  ;;  %v207_v40 = vrot.slane %v205_v31, 4  ;;  %v321_v42 = vunpack.c.l.b16 %v190_v29  ;;  %v1261_v43 = vrot.slane %v97_v14, 9 }
  0x3d   :  { %v880_v44 = vunpack.c.l.b16 %v788_v33  ;;  %v587_v45 = vrot.slane %v585_v25, 4  ;;  %v588_v46 = vrot.slane %v99_v34, 5  ;;  %v211_v47 = vshll.u32 %v99_v34, 16 }
  0x3e   :  { %1252 = vmatmul.msk.bf16.gmra.mxu1 %vm352_vm7, %v1300_v22  ;;  %v881_v49 = vunpack.c.l.b16 %v795_v38  ;;  %v198_v50 = vor.u32 %v197_v36, %v194_v35  ;;  %v796_v51 = vrot.slane %v192_v26, 5  ;;  %v797_v52 = vrot.slane %v195_v27, 6 }
  0x3f   :  { %v208_v53 = vor.u32 %v207_v40, %v203_v39  ;;  %v800_v54 = vrot.slane %v205_v31, 5  ;;  %v801_v55 = vrot.slane %v201_v30, 6  ;;  %v805_v56 = vshrl.u32 %v99_v34, 16 }
  0x40   :  { %v334_v57 = vpack.c.b16 %v321_v42, %v320_v41  ;;  %v586_v58 = vsel %vm1509_vm4, %v1261_v43, %v585_v25  ;;  %v589_v59 = vsel %vm1509_vm4, %v587_v45, %v588_v46  ;;  %v894_v60 = vpack.c.b16 %v881_v49, %v880_v44 }
  0x41   :  { %v199_v61 = vrot.slane %v198_v50, 4  ;;  %v213_v62 = vrot.slane %v211_v47, 5  ;;  %v798_v63 = vor.u32 %v797_v52, %v796_v51  ;;  %v209_v0 = vrot.slane %v208_v53, 4  ;;  %v103_v50 = vld [vmem:[#allocation2 + $0x50] sm:$0xf] }
  0x42   :  { %v802_v1 = vor.u32 %v801_v55, %v800_v54  ;;  %v807_v2 = vrot.slane %v805_v56, 5  ;;  %v808_v3 = vrot.slane %v211_v47, 6  ;;  %v629_v7 = vunpack.c.l.b16 %v586_v58  ;;  %v104_v54 = vld [vmem:[#allocation2 + $0x54] sm:$0xf] }
  0x43   :  { %1276 = vmatmul.msk.bf16.gmra.mxu2 %vm352_vm7, %v641_v32  ;;  %v630_v8 = vunpack.c.l.b16 %v589_v59  ;;  %v204_v9 = vsel %vm1520_vm8, %v199_v61, %v203_v39  ;;  %v799_v10 = vrot.slane %v798_v63, 4  ;;  %v214_v12 = vsel %vm1520_vm8, %v209_v0, %v213_v62 }
  0x44   :  { %v804_v13 = vrot.slane %v802_v1, 4  ;;  %v809_v14 = vor.u32 %v808_v3, %v807_v2  ;;  %v216_v15 = vshrl.u32 %v100_v4, 16  ;;  %v219_v17 = vshll.u32 %v100_v4, 16  ;;  %v1302_v3 = vld [vmem:[#allocation2 + $0x40] sm:$0xff] }
  0x45   :  { %v225_v18 = vshll.u32 %v101_v6, 16  ;;  %v229_v19 = vshrl.u32 %v101_v6, 16  ;;  %v642_v20 = vpack.c.b16 %v630_v8, %v629_v7  ;;  %v322_v21 = vunpack.c.l.b16 %v204_v9  ;;  %v105_v8 = vld [vmem:[#allocation2 + $0x58] sm:$0xf] }
  0x46   :  { %v323_v22 = vunpack.c.l.b16 %v214_v12  ;;  %v592_v23 = vrot.slane %v101_v6, 5  ;;  %v803_v24 = vsel %vm1526_vm9, %v799_v10, %v802_v1  ;;  %v810_v25 = vsel %vm1526_vm9, %v804_v13, %v809_v14 }
  0x47   :  { %v218_v26 = vrot.slane %v216_v15, 4  ;;  %v235_v27 = vshll.u32 %v102_v16, 16  ;;  %v221_v28 = vrot.slane %v219_v17, 5  ;;  %v227_v29 = vrot.slane %v225_v18, 5 }
  0x48   :  { %1204 = vmatmul.msk.bf16.gmra.mxu0 %vm352_vm7, %v334_v57  ;;  %v231_v30 = vrot.slane %v229_v19, 4  ;;  %v811_v31 = vrot.slane %v216_v15, 5  ;;  %v812_v32 = vrot.slane %v219_v17, 6  ;;  %v815_v33 = vrot.slane %v229_v19, 5 }
  0x49   :  { %v816_v34 = vrot.slane %v225_v18, 6  ;;  %v820_v35 = vshrl.u32 %v102_v16, 16  ;;  %v882_v36 = vunpack.c.l.b16 %v803_v24  ;;  %v883_v38 = vunpack.c.l.b16 %v810_v25 }
  0x4a   :  { %v1262_v39 = vrot.slane %v100_v4, 9  ;;  %v594_v40 = vrot.slane %v592_v23, 4  ;;  %v595_v41 = vrot.slane %v102_v16, 5  ;;  %v335_v42 = vpack.c.b16 %v323_v22, %v322_v21 }
  0x4b   :  { %1292 = vmatmul.msk.bf16.gmra.mxu3 %vm352_vm7, %v894_v60  ;;  %v222_v43 = vor.u32 %v221_v28, %v218_v26  ;;  %v232_v44 = vor.u32 %v231_v30, %v227_v29  ;;  %v813_v45 = vor.u32 %v812_v32, %v811_v31  ;;  %v817_v46 = vor.u32 %v816_v34, %v815_v33 }
  0x4c   :  { %v822_v47 = vrot.slane %v820_v35, 5  ;;  %v823_v49 = vrot.slane %v235_v27, 6  ;;  %v895_v51 = vpack.c.b16 %v883_v38, %v882_v36  ;;  %v593_v52 = vsel %vm1509_vm4, %v1262_v39, %v592_v23 }
  0x4d   :  { %v596_v53 = vsel %vm1509_vm4, %v594_v40, %v595_v41  ;;  %v223_v55 = vrot.slane %v222_v43, 4  ;;  %v233_v56 = vrot.slane %v232_v44, 4  ;;  %v237_v57 = vrot.slane %v235_v27, 5  ;;  %v106_v43 = vld [vmem:[#allocation2 + $0x60] sm:$0xf] }
  0x4e   :  { %1253 = vmatmul.msk.bf16.gmra.mxu1 %vm352_vm7, %v1301_v11  ;;  %v240_v58 = vshrl.u32 %v103_v50, 16  ;;  %v814_v59 = vrot.slane %v813_v45, 4  ;;  %v819_v60 = vrot.slane %v817_v46, 4  ;;  %v824_v61 = vor.u32 %v823_v49, %v822_v47  ;;  %v107_v45 = vld [vmem:[#allocation2 + $0x64] sm:$0xf] }
  0x4f   :  { %v243_v62 = vshll.u32 %v103_v50, 16  ;;  %v631_v63 = vunpack.c.l.b16 %v593_v52  ;;  %v632_v0 = vunpack.c.l.b16 %v596_v53  ;;  %v249_v1 = vshll.u32 %v104_v54, 16 }
  0x50   :  { %v253_v2 = vshrl.u32 %v104_v54, 16  ;;  %v599_v4 = vrot.slane %v104_v54, 5  ;;  %v228_v6 = vsel %vm1520_vm8, %v223_v55, %v227_v29  ;;  %v238_v7 = vsel %vm1520_vm8, %v233_v56, %v237_v57  ;;  %v1303_v55 = vld [vmem:[#allocation2 + $0x50] sm:$0xff] }
  0x51   :  { %v818_v9 = vsel %vm1526_vm9, %v814_v59, %v817_v46  ;;  %v825_v10 = vsel %vm1526_vm9, %v819_v60, %v824_v61  ;;  %v242_v11 = vrot.slane %v240_v58, 4  ;;  %v245_v12 = vrot.slane %v243_v62, 5 }
  0x52   :  { %v643_v13 = vpack.c.b16 %v632_v0, %v631_v63  ;;  %v251_v14 = vrot.slane %v249_v1, 5  ;;  %v255_v15 = vrot.slane %v253_v2, 4  ;;  %v324_v16 = vunpack.c.l.b16 %v228_v6 }
  0x53   :  { %1277 = vmatmul.msk.bf16.gmra.mxu2 %vm352_vm7, %v642_v20  ;;  %v1263_v17 = vrot.slane %v103_v50, 9  ;;  %v601_v18 = vrot.slane %v599_v4, 4  ;;  %v602_v19 = vrot.slane %v105_v8, 5  ;;  %v325_v20 = vunpack.c.l.b16 %v238_v7 }
  0x54   :  { %v884_v21 = vunpack.c.l.b16 %v818_v9  ;;  %v885_v22 = vunpack.c.l.b16 %v825_v10  ;;  %v826_v23 = vrot.slane %v240_v58, 5  ;;  %v246_v24 = vor.u32 %v245_v12, %v242_v11  ;;  %v108_v58 = vld [vmem:[#allocation2 + $0x68] sm:$0xf] }
  0x55   :  { %v827_v25 = vrot.slane %v243_v62, 6  ;;  %v830_v26 = vrot.slane %v253_v2, 5  ;;  %v831_v27 = vrot.slane %v249_v1, 6  ;;  %v256_v28 = vor.u32 %v255_v15, %v251_v14 }
  0x56   :  { %v259_v29 = vshll.u32 %v105_v8, 16  ;;  %v835_v30 = vshrl.u32 %v105_v8, 16  ;;  %v336_v31 = vpack.c.b16 %v325_v20, %v324_v16  ;;  %v600_v32 = vsel %vm1509_vm4, %v1263_v17, %v599_v4 }
  0x57   :  { %v603_v33 = vsel %vm1509_vm4, %v601_v18, %v602_v19  ;;  %v896_v34 = vpack.c.b16 %v885_v22, %v884_v21  ;;  %v247_v35 = vrot.slane %v246_v24, 4  ;;  %v828_v36 = vor.u32 %v827_v25, %v826_v23 }
  0x58   :  { %1205 = vmatmul.msk.bf16.gmra.mxu0 %vm352_vm7, %v335_v42  ;;  %v832_v38 = vor.u32 %v831_v27, %v830_v26  ;;  %v257_v39 = vrot.slane %v256_v28, 4  ;;  %v261_v40 = vrot.slane %v259_v29, 5  ;;  %v837_v41 = vrot.slane %v835_v30, 5 }
  0x59   :  { %v838_v42 = vrot.slane %v259_v29, 6  ;;  %v633_v44 = vunpack.c.l.b16 %v600_v32  ;;  %v634_v46 = vunpack.c.l.b16 %v603_v33  ;;  %v252_v47 = vsel %vm1520_vm8, %v247_v35, %v251_v14  ;;  %v109_v35 = vld [vmem:[#allocation2 + $0x70] sm:$0xf] }
  0x5a   :  { %v829_v49 = vrot.slane %v828_v36, 4  ;;  %v834_v50 = vrot.slane %v832_v38, 4  ;;  %v264_v53 = vshrl.u32 %v106_v43, 16  ;;  %v267_v54 = vshll.u32 %v106_v43, 16  ;;  %v110_v36 = vld [vmem:[#allocation2 + $0x74] sm:$0xf] }
  0x5b   :  { %1293 = vmatmul.msk.bf16.gmra.mxu3 %vm352_vm7, %v895_v51  ;;  %v262_v51 = vsel %vm1520_vm8, %v257_v39, %v261_v40  ;;  %v839_v52 = vor.u32 %v838_v42, %v837_v41  ;;  %v273_v56 = vshll.u32 %v107_v45, 16  ;;  %v277_v57 = vshrl.u32 %v107_v45, 16 }
  0x5c   :  { %v644_v59 = vpack.c.b16 %v634_v46, %v633_v44  ;;  %v326_v60 = vunpack.c.l.b16 %v252_v47  ;;  %v327_v61 = vunpack.c.l.b16 %v262_v51  ;;  %v833_v62 = vsel %vm1526_vm9, %v829_v49, %v832_v38  ;;  %v1304_v38 = vld [vmem:[#allocation2 + $0x60] sm:$0xff]  ;;  %v111_v51 = vld [vmem:[#allocation2 + $0x78] sm:$0xf] }
  0x5d   :  { %v840_v63 = vsel %vm1526_vm9, %v834_v50, %v839_v52  ;;  %v606_v0 = vrot.slane %v107_v45, 5  ;;  %v266_v1 = vrot.slane %v264_v53, 4  ;;  %v269_v2 = vrot.slane %v267_v54, 5 }
  0x5e   :  { %1254 = vmatmul.msk.bf16.gmra.mxu1 %vm352_vm7, %v1302_v3  ;;  %v275_v3 = vrot.slane %v273_v56, 5  ;;  %v279_v4 = vrot.slane %v277_v57, 4  ;;  %v283_v6 = vshll.u32 %v108_v58, 16  ;;  %v841_v7 = vrot.slane %v264_v53, 5 }
  0x5f   :  { %v842_v8 = vrot.slane %v267_v54, 6  ;;  %v845_v9 = vrot.slane %v277_v57, 5  ;;  %v846_v10 = vrot.slane %v273_v56, 6  ;;  %v850_v11 = vshrl.u32 %v108_v58, 16 }
  0x60   :  { %v337_v12 = vpack.c.b16 %v327_v61, %v326_v60  ;;  %v887_v14 = vunpack.c.l.b16 %v840_v63  ;;  %v1264_v15 = vrot.slane %v106_v43, 9  ;;  %v608_v16 = vrot.slane %v606_v0, 4 }
  0x61   :  { %v609_v17 = vrot.slane %v108_v58, 5  ;;  %v270_v18 = vor.u32 %v269_v2, %v266_v1  ;;  %v280_v19 = vor.u32 %v279_v4, %v275_v3  ;;  %v843_v20 = vor.u32 %v842_v8, %v841_v7 }
  0x62   :  { %v847_v21 = vor.u32 %v846_v10, %v845_v9  ;;  %v852_v22 = vrot.slane %v850_v11, 5  ;;  %v853_v23 = vrot.slane %v283_v6, 6  ;;  %v607_v25 = vsel %vm1509_vm4, %v1264_v15, %v606_v0 }
  0x63   :  { %1278 = vmatmul.msk.bf16.gmra.mxu2 %vm352_vm7, %v643_v13  ;;  %v886_v13 = vunpack.c.l.b16 %v833_v62  ;;  %v610_v26 = vsel %vm1509_vm4, %v608_v16, %v609_v17  ;;  %v271_v27 = vrot.slane %v270_v18, 4  ;;  %v285_v28 = vrot.slane %v283_v6, 5 }
  0x64   :  { %v281_v29 = vrot.slane %v280_v19, 4  ;;  %v844_v30 = vrot.slane %v843_v20, 4  ;;  %v854_v32 = vor.u32 %v853_v23, %v852_v22  ;;  %v635_v33 = vunpack.c.l.b16 %v607_v25  ;;  %v1305_v20 = vld [vmem:[#allocation2 + $0x70] sm:$0xff] }
  0x65   :  { %v897_v24 = vpack.c.b16 %v887_v14, %v886_v13  ;;  %v276_v39 = vsel %vm1520_vm8, %v271_v27, %v275_v3  ;;  %v288_v43 = vshrl.u32 %v109_v35, 16  ;;  %v291_v44 = vshll.u32 %v109_v35, 16 }
  0x66   :  { %v286_v40 = vsel %vm1520_vm8, %v281_v29, %v285_v28  ;;  %v848_v41 = vsel %vm1526_vm9, %v844_v30, %v847_v21  ;;  %v297_v45 = vshll.u32 %v110_v36, 16  ;;  %v301_v46 = vshrl.u32 %v110_v36, 16 }
  0x67   :  { %v613_v49 = vrot.slane %v110_v36, 5  ;;  %v328_v50 = vunpack.c.l.b16 %v276_v39  ;;  %v329_v52 = vunpack.c.l.b16 %v286_v40  ;;  %v888_v53 = vunpack.c.l.b16 %v848_v41 }
  0x68   :  { %1206 = vmatmul.msk.bf16.gmra.mxu0 %vm352_vm7, %v336_v31  ;;  %v849_v31 = vrot.slane %v847_v21, 4  ;;  %v290_v56 = vrot.slane %v288_v43, 4  ;;  %v293_v57 = vrot.slane %v291_v44, 5  ;;  %v299_v58 = vrot.slane %v297_v45, 5 }
  0x69   :  { %v615_v60 = vrot.slane %v613_v49, 4  ;;  %v616_v61 = vrot.slane %v111_v51, 5  ;;  %v307_v62 = vshll.u32 %v111_v51, 16  ;;  %v856_v63 = vrot.slane %v288_v43, 5 }
  0x6a   :  { %v855_v42 = vsel %vm1526_vm9, %v849_v31, %v854_v32  ;;  %v857_v0 = vrot.slane %v291_v44, 6  ;;  %v860_v1 = vrot.slane %v301_v46, 5  ;;  %v861_v2 = vrot.slane %v297_v45, 6 }
  0x6b   :  { %1294 = vmatmul.msk.bf16.gmra.mxu3 %vm352_vm7, %v896_v34  ;;  %v636_v34 = vunpack.c.l.b16 %v610_v26  ;;  %v889_v54 = vunpack.c.l.b16 %v855_v42  ;;  %v865_v3 = vshrl.u32 %v111_v51, 16  ;;  %v338_v4 = vpack.c.b16 %v329_v52, %v328_v50 }
  0x6c   :  { %v294_v6 = vor.u32 %v293_v57, %v290_v56  ;;  %v617_v10 = vsel %vm1509_vm4, %v615_v60, %v616_v61  ;;  %v858_v11 = vor.u32 %v857_v0, %v856_v63  ;;  %v868_v14 = vrot.slane %v307_v62, 6  ;;  %v1662_v60 = vld [vmem:[#allocation7 + $0x8] sm:$0xff]  ;;  %v1124_v63 = vld [vmem:[#allocation8 + $0x68] sm:$0xff] }
  0x6d   :  { %v645_v47 = vpack.c.b16 %v636_v34, %v635_v33  ;;  %v898_v8 = vpack.c.b16 %v889_v54, %v888_v53  ;;  %v867_v13 = vrot.slane %v865_v3, 5  ;;  %v309_v17 = vrot.slane %v307_v62, 5  ;;  %v1125_v62 = vld [vmem:[#allocation8 + $0x70] sm:$0xff] }
  0x6e   :  { %1255 = vmatmul.msk.bf16.gmra.mxu1 %vm352_vm7, %v1303_v55  ;;  %v1265_v55 = vrot.slane %v109_v35, 9  ;;  %v295_v15 = vrot.slane %v294_v6, 4  ;;  %v638_v19 = vunpack.c.l.b16 %v617_v10  ;;  %v859_v21 = vrot.slane %v858_v11, 4  ;;  %1155 = vmatpush.msrb.mxu0 %v1125_v62 }
  0x6f   :  { %v869_v23 = vor.u32 %v868_v14, %v867_v13  ;;  %vm1143_vm12 = vcmask 1043459   ;;  %vm1145_vm13 = vcmask 1044484   ;;  %vm1147_vm14 = vcmask 1045509  }
  0x70   :  { %v614_v9 = vsel %vm1509_vm4, %v1265_v55, %v613_v49  ;;  %v300_v5 = vsel %vm1520_vm8, %v295_v15, %v299_v58  ;;  %1156 = vmatpush.msrb.mxu0 %v1124_v63  ;;  %vm1149_vm15 = vcmask 1046534   ;;  %vm1151_vm0 = vcmask 1047559  }
  0x71   :  { %v637_v18 = vunpack.c.l.b16 %v614_v9  ;;  %v330_v28 = vunpack.c.l.b16 %v300_v5  ;;  %v1123_v5 = vld [vmem:[#allocation8 + $0x60] sm:$0xff] }
  0x72   :  { %1157 = vmatpush.msrb.mxu0 %v1123_v5 }
  0x73   :  { %1279 = vmatmul.msk.bf16.gmra.mxu2 %vm352_vm7, %v644_v59  ;;  %v303_v59 = vrot.slane %v301_v46, 4  ;;  %v646_v25 = vpack.c.b16 %v638_v19, %v637_v18  ;;  %v1656_v46 = vld [vmem:[%s1708_s2] ss:$0 sm:$0xff] }
  0x75   :  { %v304_v7 = vor.u32 %v303_v59, %v299_v58  ;;  %v1660_v59 = vld [vmem:[#allocation7] sm:$0xff] }
  0x77   :  { %v305_v16 = vrot.slane %v304_v7, 4 }
  0x78   :  { %1207 = vmatmul.msk.bf16.gmra.mxu0 %vm352_vm7, %v337_v12  ;;  %v862_v12 = vor.u32 %v861_v2, %v860_v1 }
  0x7a   :  { %v864_v22 = vrot.slane %v862_v12, 4  ;;  %v863_v26 = vsel %vm1526_vm9, %v859_v21, %v862_v12 }
  0x7b   :  { %1295 = vmatmul.msk.bf16.gmra.mxu3 %vm352_vm7, %v897_v24  ;;  %v310_v24 = vsel %vm1520_vm8, %v305_v16, %v309_v17  ;;  %v890_v30 = vunpack.c.l.b16 %v863_v26 }
  0x7c   :  { %v870_v27 = vsel %vm1526_vm9, %v864_v22, %v869_v23  ;;  %v331_v29 = vunpack.c.l.b16 %v310_v24  ;;  %v1122_v24 = vld [vmem:[#allocation8 + $0x58] sm:$0xff] }
  0x7d   :  { %v891_v31 = vunpack.c.l.b16 %v870_v27  ;;  %1158 = vmatpush.msrb.mxu0 %v1122_v24 }
  0x7e   :  { %1256 = vmatmul.msk.bf16.gmra.mxu1 %vm352_vm7, %v1304_v38  ;;  %v339_v32 = vpack.c.b16 %v331_v29, %v330_v28 }
  0x7f   :  { %v899_v33 = vpack.c.b16 %v891_v31, %v890_v30 }
  0x83   :  { %1280 = vmatmul.msk.bf16.gmra.mxu2 %vm352_vm7, %v645_v47 }
  0x88   :  { %1208 = vmatmul.msk.bf16.gmra.mxu0 %vm352_vm7, %v338_v4 }
  0x8b   :  { %1296 = vmatmul.msk.bf16.gmra.mxu3 %vm352_vm7, %v898_v8 }
  0x8e   :  { %1257 = vmatmul.msk.bf16.gmra.mxu1 %vm352_vm7, %v1305_v20 }
  0x93   :  { %1281 = vmatmul.msk.bf16.gmra.mxu2 %vm352_vm7, %v646_v25 }
  0x98   :  { %1209 = vmatmul.msk.bf16.gmra.mxu0 %vm352_vm7, %v339_v32 }
  0x9b   :  { %1297 = vmatmul.msk.bf16.gmra.mxu3 %vm352_vm7, %v899_v33  ;;  %v511_v37 = vpop.f32.mrf.mxu1 }
  0xa3   :  { %v513_v34 = vpop.f32.mrf.mxu1 }
  0xa5   :  { %v386_v35 = vpop.f32.mrf.mxu0 }
  0xa6   :  { %v692_v36 = vpop.f32.mrf.mxu2  ;;  %v512_v38 = vadd.f32 %v511_v37, %v386_v35 }
  0xa8   :  { %v732_v39 = vadd.f32 %v692_v36, %v512_v38 }
  0xab   :  { %v516_v40 = vpop.f32.mrf.mxu1 }
  0xad   :  { %v388_v42 = vpop.f32.mrf.mxu0 }
  0xae   :  { %v945_v41 = vpop.f32.mrf.mxu3  ;;  %v514_v44 = vadd.f32 %v513_v34, %v388_v42  ;;  %v694_v45 = vpop.f32.mrf.mxu2 }
  0xaf   :  { %v985_v43 = vadd.f32 %v945_v41, %v732_v39 }
  0xb0   :  { %v733_v47 = vadd.f32 %v694_v45, %v514_v44 }
  0xb1   :  { %v1005_v49 = vadd.f32 %v1656_v46, %v985_v43 }
  0xb3   :  { %v518_v50 = vpop.f32.mrf.mxu1  ;;  %v1021_v56 = vmax.f32 %v1005_v49, 0.0 }
  0xb5   :  { %v391_v52 = vpop.f32.mrf.mxu0  ;;  %v1039_v0 = vmul.f32 %v1660_v59, %v1021_v56 }
  0xb6   :  { %v947_v51 = vpop.f32.mrf.mxu3  ;;  %v517_v54 = vadd.f32 %v516_v40, %v391_v52  ;;  %v697_v55 = vpop.f32.mrf.mxu2 }
  0xb7   :  { %v986_v53 = vadd.f32 %v947_v51, %v733_v47 }
  0xb8   :  { %v734_v58 = vadd.f32 %v697_v55, %v517_v54 }
  0xb9   :  { %v1006_v57 = vadd.f32 %v1656_v46, %v986_v53 }
  0xbb   :  { %v1022_v61 = vmax.f32 %v1006_v57, 0.0  ;;  %v521_v2 = vpop.f32.mrf.mxu1  ;;  %v1121_v57 = vld [vmem:[#allocation8 + $0x50] sm:$0xff] }
  0xbc   :  { %1159 = vmatpush.msrb.mxu0 %v1121_v57 }
  0xbd   :  { %v1040_v1 = vmul.f32 %v1662_v60, %v1022_v61  ;;  %v393_v4 = vpop.f32.mrf.mxu0 }
  0xbe   :  { %v950_v3 = vpop.f32.mrf.mxu3  ;;  %v519_v8 = vadd.f32 %v518_v50, %v393_v4  ;;  %v699_v9 = vpop.f32.mrf.mxu2 }
  0xbf   :  { %v1055_v6 = vmax.f32 %v1039_v0, %v1040_v1  ;;  %v987_v7 = vadd.f32 %v950_v3, %v734_v58  ;;  %v1120_v58 = vld [vmem:[#allocation8 + $0x48] sm:$0xff] }
  0xc0   :  { %v735_v10 = vadd.f32 %v699_v9, %v519_v8  ;;  %1160 = vmatpush.msrb.mxu0 %v1120_v58 }
  0xc1   :  { %v1007_v11 = vadd.f32 %v1656_v46, %v987_v7  ;;  %v1056_v15 = vrot.slane %v1055_v6, 4 }
  0xc3   :  { %v523_v12 = vpop.f32.mrf.mxu1  ;;  %v1023_v19 = vmax.f32 %v1007_v11, 0.0  ;;  %v1057_v22 = vmax.f32 %v1055_v6, %v1056_v15 }
  0xc5   :  { %v396_v14 = vpop.f32.mrf.mxu0  ;;  %v1041_v25 = vmul.f32 %v1660_v59, %v1023_v19  ;;  %v1058_v30 = vrot.slane %v1057_v22, 2 }
  0xc6   :  { %v952_v13 = vpop.f32.mrf.mxu3  ;;  %v522_v17 = vadd.f32 %v521_v2, %v396_v14  ;;  %v702_v18 = vpop.f32.mrf.mxu2 }
  0xc7   :  { %v988_v16 = vadd.f32 %v952_v13, %v735_v10  ;;  %v1059_v36 = vmax.f32 %v1057_v22, %v1058_v30  ;;  %v1119_v22 = vld [vmem:[#allocation8 + $0x40] sm:$0xff] }
  0xc8   :  { %v736_v21 = vadd.f32 %v702_v18, %v522_v17  ;;  %1161 = vmatpush.msrb.mxu0 %v1119_v22 }
  0xc9   :  { %v1008_v20 = vadd.f32 %v1656_v46, %v988_v16  ;;  %v1060_v43 = vrot.slane %v1059_v36, 1 }
  0xcb   :  { %v1024_v23 = vmax.f32 %v1008_v20, 0.0  ;;  %v526_v27 = vpop.f32.mrf.mxu1  ;;  %v1061_v54 = vmax.f32 %v1059_v36, %v1060_v43 }
  0xcd   :  { %v1042_v26 = vmul.f32 %v1662_v60, %v1024_v23  ;;  %v398_v29 = vpop.f32.mrf.mxu0  ;;  %v1118_v23 = vld [vmem:[#allocation8 + $0x38] sm:$0xff] }
  0xce   :  { %v955_v28 = vpop.f32.mrf.mxu3  ;;  %v524_v33 = vadd.f32 %v523_v12, %v398_v29  ;;  %v704_v37 = vpop.f32.mrf.mxu2  ;;  %1162 = vmatpush.msrb.mxu0 %v1118_v23  ;;  %v1111_v23 = vld [vmem:[#allocation8] sm:$0xff] }
  0xcf   :  { %v1062_v31 = vmax.f32 %v1041_v25, %v1042_v26  ;;  %v989_v32 = vadd.f32 %v955_v28, %v736_v21 }
  0xd0   :  { %v737_v35 = vadd.f32 %v704_v37, %v524_v33 }
  0xd1   :  { %v1063_v34 = vrot.slane %v1062_v31, 4  ;;  %v1009_v48 = vadd.f32 %v1656_v46, %v989_v32 }
  0xd3   :  { %v1064_v38 = vmax.f32 %v1062_v31, %v1063_v34  ;;  %v528_v40 = vpop.f32.mrf.mxu1  ;;  %v1025_v51 = vmax.f32 %v1009_v48, 0.0 }
  0xd5   :  { %v1065_v39 = vrot.slane %v1064_v38, 2  ;;  %v401_v42 = vpop.f32.mrf.mxu0  ;;  %v1043_v61 = vmul.f32 %v1660_v59, %v1025_v51  ;;  %v1115_v51 = vld [vmem:[#allocation8 + $0x20] sm:$0xff] }
  0xd6   :  { %v957_v41 = vpop.f32.mrf.mxu3  ;;  %v527_v47 = vadd.f32 %v526_v27, %v401_v42  ;;  %v707_v49 = vpop.f32.mrf.mxu2 }
  0xd7   :  { %v1066_v44 = vmax.f32 %v1064_v38, %v1065_v39  ;;  %v990_v45 = vadd.f32 %v957_v41, %v737_v35  ;;  %v1116_v41 = vld [vmem:[#allocation8 + $0x28] sm:$0xff] }
  0xd8   :  { %v738_v53 = vadd.f32 %v707_v49, %v527_v47 }
  0xd9   :  { %v1067_v50 = vrot.slane %v1066_v44, 1  ;;  %v1010_v52 = vadd.f32 %v1656_v46, %v990_v45 }
  0xdb   :  { %v1068_v55 = vmax.f32 %v1066_v44, %v1067_v50  ;;  %v1026_v56 = vmax.f32 %v1010_v52, 0.0  ;;  %v1674_v63 = vpop.f32.mrf.mxu1  ;;  %v1114_v52 = vld [vmem:[#allocation8 + $0x18] sm:$0xff] }
  0xdd   :  { %v1044_v62 = vmul.f32 %v1662_v60, %v1026_v56  ;;  %v1140_v0 = vsel %vm1139_vm10, %v1068_v55, %v1061_v54  ;;  %v403_v2 = vpop.f32.mrf.mxu0 }
  0xde   :  { %v960_v1 = vpop.f32.mrf.mxu3  ;;  %v709_v6 = vpop.f32.mrf.mxu2  ;;  %v529_v8 = vadd.f32 %v528_v40, %v403_v2  ;;  %v1117_v40 = vld [vmem:[#allocation8 + $0x30] sm:$0xff] }
  0xdf   :  { %v1069_v3 = vmax.f32 %v1043_v61, %v1044_v62  ;;  %v991_v4 = vadd.f32 %v960_v1, %v738_v53  ;;  %1163 = vmatpush.msrb.mxu0 %v1117_v40 }
  0xe0   :  { %v739_v12 = vadd.f32 %v709_v6, %v529_v8 }
  0xe1   :  { %v1070_v7 = vrot.slane %v1069_v3, 4  ;;  %v1011_v11 = vadd.f32 %v1656_v46, %v991_v4  ;;  %1164 = vmatpush.msrb.mxu0 %v1116_v41 }
  0xe3   :  { %v1071_v9 = vmax.f32 %v1069_v3, %v1070_v7  ;;  %v533_v13 = vpop.f32.mrf.mxu1  ;;  %v1027_v20 = vmax.f32 %v1011_v11, 0.0  ;;  %1165 = vmatpush.msrb.mxu0 %v1115_v51 }
  0xe5   :  { %v1072_v10 = vrot.slane %v1071_v9, 2  ;;  %v406_v15 = vpop.f32.mrf.mxu0  ;;  %v1045_v25 = vmul.f32 %v1660_v59, %v1027_v20  ;;  %1166 = vmatpush.msrb.mxu0 %v1114_v52 }
  0xe6   :  { %v962_v14 = vpop.f32.mrf.mxu3  ;;  %v712_v18 = vpop.f32.mrf.mxu2  ;;  %v532_v56 = vadd.f32 %v1674_v63, %v406_v15 }
  0xe7   :  { %v1073_v16 = vmax.f32 %v1071_v9, %v1072_v10  ;;  %v992_v17 = vadd.f32 %v962_v14, %v739_v12 }
  0xe8   :  { %v740_v1 = vadd.f32 %v712_v18, %v532_v56 }
  0xe9   :  { %v1074_v19 = vrot.slane %v1073_v16, 1  ;;  %v1012_v21 = vadd.f32 %v1656_v46, %v992_v17  ;;  %v1113_v17 = vld [vmem:[#allocation8 + $0x10] sm:$0xff] }
  0xea   :  { %1167 = vmatpush.msrb.mxu0 %v1113_v17 }
  0xeb   :  { %v1075_v5 = vmax.f32 %v1073_v16, %v1074_v19  ;;  %v1028_v24 = vmax.f32 %v1012_v21, 0.0  ;;  %v536_v27 = vpop.f32.mrf.mxu1  ;;  %v1112_v19 = vld [vmem:[#allocation8 + $0x8] sm:$0xff] }
  0xec   :  { %1168 = vmatpush.msrb.mxu0 %v1112_v19 }
  0xed   :  { %v1046_v26 = vmul.f32 %v1662_v60, %v1028_v24  ;;  %v1142_v28 = vsel %vm1141_vm11, %v1075_v5, %v1140_v0  ;;  %v408_v30 = vpop.f32.mrf.mxu0 }
  0xee   :  { %v965_v29 = vpop.f32.mrf.mxu3  ;;  %v714_v32 = vpop.f32.mrf.mxu2  ;;  %v534_v57 = vadd.f32 %v533_v13, %v408_v30  ;;  %1169 = vmatpush.msrb.mxu0 %v1111_v23 }
  0xef   :  { %v1076_v31 = vmax.f32 %v1045_v25, %v1046_v26  ;;  %v993_v12 = vadd.f32 %v965_v29, %v740_v1 }
  0xf0   :  { %v741_v2 = vadd.f32 %v714_v32, %v534_v57 }
  0xf1   :  { %v1077_v33 = vrot.slane %v1076_v31, 4  ;;  %v1013_v18 = vadd.f32 %v1656_v46, %v993_v12 }
  0xf3   :  { %v1078_v37 = vmax.f32 %v1076_v31, %v1077_v33  ;;  %v538_v48 = vpop.f32.mrf.mxu1  ;;  %v1029_v29 = vmax.f32 %v1013_v18, 0.0 }
  0xf5   :  { %v1079_v34 = vrot.slane %v1078_v37, 2  ;;  %v411_v36 = vpop.f32.mrf.mxu0 }
  0xf6   :  { %v967_v35 = vpop.f32.mrf.mxu3  ;;  %v717_v39 = vpop.f32.mrf.mxu2  ;;  %v537_v58 = vadd.f32 %v536_v27, %v411_v36 }
  0xf7   :  { %v1080_v38 = vmax.f32 %v1078_v37, %v1079_v34  ;;  %v994_v6 = vadd.f32 %v967_v35, %v741_v2 }
  0xf8   :  { %v742_v3 = vadd.f32 %v717_v39, %v537_v58 }
  0xf9   :  { %v1081_v42 = vrot.slane %v1080_v38, 1  ;;  %v1014_v63 = vadd.f32 %v1656_v46, %v994_v6 }
  0xfb   :  { %v1082_v43 = vmax.f32 %v1080_v38, %v1081_v42  ;;  %v541_v50 = vpop.f32.mrf.mxu1  ;;  %v1030_v5 = vmax.f32 %v1014_v63, 0.0  ;;  %v1047_v38 = vmul.f32 %v1660_v59, %v1029_v29 }
  0xfd   :  { %v1680_v44 = vsel %vm1143_vm12, %v1082_v43, %v1142_v28  ;;  %v413_v47 = vpop.f32.mrf.mxu0  ;;  %v1048_v37 = vmul.f32 %v1662_v60, %v1030_v5 }
  0xfe   :  { %v970_v45 = vpop.f32.mrf.mxu3  ;;  %v719_v49 = vpop.f32.mrf.mxu2  ;;  %v539_v61 = vadd.f32 %v538_v48, %v413_v47 }
  0xff   :  { %v995_v14 = vadd.f32 %v970_v45, %v742_v3  ;;  %v1083_v41 = vmax.f32 %v1047_v38, %v1048_v37 }
 0x100   :  { %v743_v4 = vadd.f32 %v719_v49, %v539_v61 }
 0x101   :  { %v1015_v20 = vadd.f32 %v1656_v46, %v995_v14 }
 0x103   :  { %v543_v0 = vpop.f32.mrf.mxu1  ;;  %v1031_v31 = vmax.f32 %v1015_v20, 0.0 }
 0x105   :  { %v416_v54 = vpop.f32.mrf.mxu0  ;;  %v1049_v39 = vmul.f32 %v1660_v59, %v1031_v31 }
 0x106   :  { %v972_v53 = vpop.f32.mrf.mxu3  ;;  %v722_v55 = vpop.f32.mrf.mxu2  ;;  %v542_v62 = vadd.f32 %v541_v50, %v416_v54 }
 0x107   :  { %v996_v10 = vadd.f32 %v972_v53, %v743_v4  ;;  %v1084_v53 = vrot.slane %v1083_v41, 4 }
 0x108   :  { %v744_v7 = vadd.f32 %v722_v55, %v542_v62 }
 0x109   :  { %v1016_v15 = vadd.f32 %v1656_v46, %v996_v10  ;;  %v1085_v61 = vmax.f32 %v1083_v41, %v1084_v53 }
 0x10b   :  { %v546_v22 = vpop.f32.mrf.mxu1  ;;  %v1032_v27 = vmax.f32 %v1016_v15, 0.0  ;;  %v1086_v6 = vrot.slane %v1085_v61, 2 }
 0x10d   :  { %v418_v9 = vpop.f32.mrf.mxu0  ;;  %v1050_v35 = vmul.f32 %v1662_v60, %v1032_v27  ;;  %v1087_v12 = vmax.f32 %v1085_v61, %v1086_v6  ;;  %v1324_v27 = vld [vmem:[%s1711_s5] ss:$0 sm:$0xff] }
 0x10e   :  { %v975_v8 = vpop.f32.mrf.mxu3  ;;  %v724_v11 = vpop.f32.mrf.mxu2  ;;  %v544_v16 = vadd.f32 %v543_v0, %v418_v9 }
 0x10f   :  { %v997_v13 = vadd.f32 %v975_v8, %v744_v7  ;;  %v1090_v47 = vmax.f32 %v1049_v39, %v1050_v35  ;;  %v1088_v15 = vrot.slane %v1087_v12, 1 }
 0x110   :  { %v745_v21 = vadd.f32 %v724_v11, %v544_v16 }
 0x111   :  { %v1017_v24 = vadd.f32 %v1656_v46, %v997_v13  ;;  %v1091_v55 = vrot.slane %v1090_v47, 4 }
 0x113   :  { %v1033_v34 = vmax.f32 %v1017_v24, 0.0  ;;  %v548_v50 = vpop.f32.mrf.mxu1  ;;  %v1092_v0 = vmax.f32 %v1090_v47, %v1091_v55 }
 0x115   :  { %v421_v26 = vpop.f32.mrf.mxu0  ;;  %v1051_v42 = vmul.f32 %v1660_v59, %v1033_v34  ;;  %v1093_v7 = vrot.slane %v1092_v0, 2 }
 0x116   :  { %v977_v25 = vpop.f32.mrf.mxu3  ;;  %v727_v30 = vpop.f32.mrf.mxu2  ;;  %v547_v33 = vadd.f32 %v546_v22, %v421_v26 }
 0x117   :  { %v998_v28 = vadd.f32 %v977_v25, %v745_v21  ;;  %v1094_v14 = vmax.f32 %v1092_v0, %v1093_v7  ;;  %v1089_v21 = vmax.f32 %v1087_v12, %v1088_v15 }
 0x118   :  { %v746_v40 = vadd.f32 %v727_v30, %v547_v33 }
 0x119   :  { %v1018_v32 = vadd.f32 %v1656_v46, %v998_v28  ;;  %v1095_v19 = vrot.slane %v1094_v14, 1 }
 0x11b   :  { %v1034_v36 = vmax.f32 %v1018_v32, 0.0 }
 0x11d   :  { %v1052_v48 = vmul.f32 %v1662_v60, %v1034_v36  ;;  %v423_v45 = vpop.f32.mrf.mxu0 }
 0x11e   :  { %v980_v43 = vpop.f32.mrf.mxu3  ;;  %v549_v52 = vadd.f32 %v548_v50, %v423_v45  ;;  %v729_v54 = vpop.f32.mrf.mxu2 }
 0x11f   :  { %v1097_v49 = vmax.f32 %v1051_v42, %v1052_v48  ;;  %v999_v51 = vadd.f32 %v980_v43, %v746_v40 }
 0x120   :  { %v747_v58 = vadd.f32 %v729_v54, %v549_v52 }
 0x121   :  { %v1098_v56 = vrot.slane %v1097_v49, 4  ;;  %v1019_v57 = vadd.f32 %v1656_v46, %v999_v51 }
 0x123   :  { %v1099_v2 = vmax.f32 %v1097_v49, %v1098_v56  ;;  %v1035_v3 = vmax.f32 %v1019_v57, 0.0 }
 0x125   :  { %v1100_v9 = vrot.slane %v1099_v2, 2  ;;  %v1053_v10 = vmul.f32 %v1660_v59, %v1035_v3  ;;  %v1146_v59 = vsel %vm1145_vm13, %v1089_v21, %v1680_v44 }
 0x126   :  { %v982_v62 = vpop.f32.mrf.mxu3 }
 0x127   :  { %v1000_v1 = vadd.f32 %v982_v62, %v747_v58  ;;  %v1101_v63 = vmax.f32 %v1099_v2, %v1100_v9 }
 0x129   :  { %v1020_v4 = vadd.f32 %v1656_v46, %v1000_v1  ;;  %v1102_v18 = vrot.slane %v1101_v63, 1  ;;  %v1096_v46 = vmax.f32 %v1094_v14, %v1095_v19 }
 0x12b   :  { %v1036_v8 = vmax.f32 %v1020_v4, 0.0  ;;  %v1103_v23 = vmax.f32 %v1101_v63, %v1102_v18  ;;  %v1148_v24 = vsel %vm1147_vm14, %v1096_v46, %v1146_v59 }
 0x12d   :  { %v1054_v11 = vmul.f32 %v1662_v60, %v1036_v8  ;;  %v1150_v25 = vsel %vm1149_vm15, %v1103_v23, %v1148_v24 }
 0x12f   :  { %v1104_v16 = vmax.f32 %v1053_v10, %v1054_v11 }
 0x131   :  { %v1105_v13 = vrot.slane %v1104_v16, 4 }
 0x133   :  { %v1106_v17 = vmax.f32 %v1104_v16, %v1105_v13 }
 0x135   :  { %v1107_v20 = vrot.slane %v1106_v17, 2 }
 0x137   :  { %v1108_v22 = vmax.f32 %v1106_v17, %v1107_v20 }
 0x139   :  { %v1109_v5 = vrot.slane %v1108_v22, 1 }
 0x13b   :  { %v1110_v60 = vmax.f32 %v1108_v22, %v1109_v5 }
 0x13d   :  { %v1152_v26 = vsel %vm1151_vm0, %v1110_v60, %v1150_v25 }
 0x13e   :  { %1170 = vmatmul.f32.vlgmr.msrb.gmra.mxu0 %v1152_v26 }
 0x1bb   :  { %v1171_v28 = vpop.f32.mrf.mxu0 }
 0x1bc   :  { %v1172_v29 = vadd.f32 %v1324_v27, %v1171_v28 }
 0x1be   :  { %1174 = vst [vmem:[#allocation10] sm:$0xff] %v1172_v29 }
 0x1bf   :  { %1185 = dma.vmem_to_hbm [thread:$0]  %s1181_s21, 128, %s1183_s24, [#allocation4]  }
 0x1c0   :  { %1451 = dma.done.wait [#allocation4], 128  }
 0x1c1   :  { %1452 = vsyncadd [#allocation4], 4294967168 }
 0x1c2   :  { %1190 = vsyncpa [#allocation3], 1 }
 0x1c3   :  { %1191 = vsyncpa [#allocation6], 1 }
 0x1c4   :  { %1192 = vsyncpa [#allocation9], 1 }
 0x1c5   :  { %1193 = vsyncpa [#allocation4], 1 }

</bundles_post_ra>
